<compile_context>
chip_gen: v6e
topology: v6e:2x2x1
jax: 0.10.0
libtpu: 0.0.40
codegen_flags: <defaults>
</compile_context>

<pallas_src>
import jax
import jax.numpy as jnp
import numpy as np
from jax import lax
from jax.experimental import pallas as pl
from jax.experimental.pallas import tpu as pltpu


def _upsample_kernel(x_ref, halo_ref, w_ref, o_ref):
    """One (batch, L-tile) grid point.

    x_ref:    (1, T, C_in)      bf16  current tile of x (channels-last)
    halo_ref: (1, 1, 2, C_in)   bf16  row 0 = x[tile_start-1], row 1 = x[tile_end]
    w_ref:    (3*C_in, C_pad)   bf16  [W_self; W_prev; W_next], lane-padded
    o_ref:    (1, T, C_pad)     f32   y[t, r*C_out + co]  (+ zero padding lanes)
    """
    x0 = x_ref[0].astype(jnp.float32)            # (T, C_in); f32 selects (v5e-safe)
    halo = halo_ref[0, 0].astype(jnp.float32)    # (2, C_in)
    t = x0.shape[0]
    rid = lax.broadcasted_iota(jnp.int32, x0.shape, 0)

    # x[q-1]: XLU roll down one row; row 0 comes from the previous tile (or 0).
    x_prev = pltpu.roll(x0, shift=1, axis=0)
    x_prev = jnp.where(rid == 0, halo[0:1, :], x_prev)
    # x[q+1]: XLU roll up one row; last row comes from the next tile (or 0).
    x_next = pltpu.roll(x0, shift=t - 1, axis=0)
    x_next = jnp.where(rid == t - 1, halo[1:2, :], x_next)

    # Fused contraction: single MXU push, K = 3*C_in instead of three K = C_in.
    x_aug = jnp.concatenate([x0, x_prev, x_next], axis=-1).astype(jnp.bfloat16)
    y = jnp.dot(x_aug, w_ref[...], preferred_element_type=jnp.float32)
    o_ref[...] = y[None, :, :]


def _round_up(v, m):
    return (v + m - 1) // m * m


def _pick_tile_l(l, max_tile=512):
    if l <= max_tile:
        return l
    start = max_tile - (max_tile % 8)
    for t in range(start, 7, -8):
        if l % t == 0:
            return t
    return l


def upsample_net_forward(x_ncl, w_sn, upsample_factor, tile_l=None):
    """UpsampleNet.forward.  x_ncl: (N, C_in, L) f32; w_sn: (C_in, C_out, 2*S)."""
    n, c_in, l = x_ncl.shape
    s = int(upsample_factor)
    p = s // 2
    c_out = w_sn.shape[1]

    if tile_l is None:
        tile_l = _pick_tile_l(l)
    assert l % tile_l == 0, "L must be divisible by tile_l"
    num_tiles = l // tile_l

    # ---- weights: phase-rearranged slabs, fused + lane-padded (setup glue) ----
    zeros = lambda k: jnp.zeros((c_in, c_out, k), w_sn.dtype)
    w_self = w_sn[:, :, p:p + s]                                       # taps for x[q]
    w_prev = jnp.concatenate([w_sn[:, :, s + p:], zeros(p)], axis=2)   # taps for x[q-1]
    w_next = jnp.concatenate([zeros(s - p), w_sn[:, :, :p]], axis=2)   # taps for x[q+1]

    def flat(ws):   # (C_in, C_out, S) -> (C_in, S*C_out), col = r*C_out + co
        return jnp.transpose(ws, (0, 2, 1)).reshape(c_in, s * c_out)

    w_fused = jnp.concatenate([flat(w_self), flat(w_prev), flat(w_next)], axis=0)
    c_cols = s * c_out
    c_pad = _round_up(c_cols, 128)                 # lane-dense output stores
    if c_pad > c_cols:
        w_fused = jnp.pad(w_fused, ((0, 0), (0, c_pad - c_cols)))
    w_fused = w_fused.astype(jnp.bfloat16)         # (3*C_in, C_pad)

    # ---- activations: channels-last bf16 + per-tile halo rows -----------------
    # TODO(synk): in a channels-last model pipeline this transpose (and the one
    # after the kernel) disappears; it is NCL<->NLC interface glue only.
    x_nlc = jnp.transpose(x_ncl, (0, 2, 1)).astype(jnp.bfloat16)   # (N, L, C_in)
    x_zpad = jnp.pad(x_nlc, ((0, 0), (1, 1), (0, 0)))              # (N, L+2, C_in)
    prev_rows = x_zpad[:, 0:l:tile_l, :]                # x[tile_start-1] (0 at edge)
    next_rows = x_zpad[:, tile_l + 1:l + 2:tile_l, :]   # x[tile_end]     (0 at edge)
    halo = jnp.stack([prev_rows, next_rows], axis=2)    # (N, nT, 2, C_in)

    # ---- VMEM budget (double-buffered tiles; leaves margin on v7x's 64 MiB) ---
    est = 2 * (tile_l * c_in * 2 + tile_l * c_pad * 4
               + 3 * c_in * c_pad * 2 + 2 * c_in * 2)
    vmem_limit = int(min(max(4 * est, 8 << 20), 48 << 20))

    y = pl.pallas_call(
        _upsample_kernel,
        out_shape=jax.ShapeDtypeStruct((n, l, c_pad), jnp.float32),
        grid=(n, num_tiles),
        in_specs=[
            pl.BlockSpec((1, tile_l, c_in), lambda b, li: (b, li, 0)),
            pl.BlockSpec((1, 1, 2, c_in), lambda b, li: (b, li, 0, 0)),
            pl.BlockSpec((3 * c_in, c_pad), lambda b, li: (0, 0)),
        ],
        out_specs=pl.BlockSpec((1, tile_l, c_pad), lambda b, li: (b, li, 0)),
        compiler_params=pltpu.CompilerParams(
            dimension_semantics=("parallel", "parallel"),
            vmem_limit_bytes=vmem_limit),
    )(x_nlc, halo, w_fused)

    # glue: drop lane padding, (N, L, S*C_out) -> (N, L*S, C_out) -> NCL
    y = y[:, :, :c_cols].reshape(n, l * s, c_out)
    return jnp.transpose(y, (0, 2, 1))


def _orthogonal_init(key, c_in, c_out, k):
    # mimics nn.init.orthogonal_ on weight of shape (C_in, C_out, K)
    rows, cols = c_in, c_out * k
    a = jax.random.normal(key, (max(rows, cols), min(rows, cols)), jnp.float32)
    q, r = jnp.linalg.qr(a)
    q = q * jnp.sign(jnp.diagonal(r))
    if rows < cols:
        q = q.T                                          # orthonormal rows
    return q.reshape(c_in, c_out, k)


def _spectral_normalize(w, key, n_iter=50):
    # torch spectral_norm on ConvTranspose1d uses dim=1 -> matrix (C_out, C_in*K)
    # (converged power iteration instead of torch's 1-step running estimate)
    c_in, c_out, k = w.shape
    wmat = jnp.transpose(w, (1, 0, 2)).reshape(c_out, c_in * k)
    u = jax.random.normal(key, (c_out,), jnp.float32)
    u = u / (jnp.linalg.norm(u) + 1e-12)
    v = wmat.T @ u
    for _ in range(n_iter):
        v = wmat.T @ u
        v = v / (jnp.linalg.norm(v) + 1e-12)
        u = wmat @ v
        u = u / (jnp.linalg.norm(u) + 1e-12)
    sigma = u @ (wmat @ v)
    return w / sigma


def _reference(x_ncl, w, s):
    # straightforward numpy ConvTranspose1d (stride=s, K=2s, pad=s//2) + trunc
    x = np.asarray(x_ncl, np.float32)
    w = np.asarray(w, np.float32)
    n, c_in, l = x.shape
    c_out = w.shape[1]
    k = 2 * s
    p = s // 2
    full = (l - 1) * s - 2 * p + k
    y = np.zeros((n, c_out, full), np.float32)
    for li in range(l):
        for ki in range(k):
            t = li * s - p + ki
            if 0 <= t < full:
                y[:, :, t] += x[:, :, li] @ w[:, :, ki]
    return y[:, :, : l * s]


if __name__ == "__main__":
    key = jax.random.PRNGKey(0)
    k_w, k_u, k_x = jax.random.split(key, 3)

    # input_size=8, output_size=16, upsample_factor=4  (small demo shapes)
    N, C_IN, C_OUT, L, S = 2, 8, 16, 64, 4
    TILE_L = 16                        # 4 L-tiles per batch -> exercises halos

    w = _orthogonal_init(k_w, C_IN, C_OUT, 2 * S)
    w_sn = _spectral_normalize(w, k_u)
    x = jax.random.normal(k_x, (N, C_IN, L), jnp.float32)

    y = upsample_net_forward(x, w_sn, S, tile_l=TILE_L)
    y = jax.block_until_ready(y)
    assert y.shape == (N, C_OUT, L * S)

    # Reference uses the same bf16-rounded operands the kernel consumes
    # (the bf16 cast is the only intentional numeric difference vs f32 torch).
    x_bf = np.asarray(x.astype(jnp.bfloat16).astype(jnp.float32))
    w_bf = np.asarray(w_sn.astype(jnp.bfloat16).astype(jnp.float32))
    y_ref = _reference(x_bf, w_bf, S)
    np.testing.assert_allclose(np.asarray(y), y_ref, rtol=2e-3, atol=2e-3)
    print("KERNEL_OK")
</pallas_src>

<mosaic_0001>
module attributes {stable_mosaic.version = 11 : i64} {
  func.func @_upsample_kernel(%arg0: i32, %arg1: i32, %arg2: memref<1x16x8xbf16, #tpu.memory_space<vmem>>, %arg3: memref<1x1x2x8xbf16, #tpu.memory_space<vmem>>, %arg4: memref<24x128xbf16, #tpu.memory_space<vmem>>, %arg5: memref<1x16x128xf32, #tpu.memory_space<vmem>>) attributes {dimension_semantics = [#tpu.dimension_semantics<parallel>, #tpu.dimension_semantics<parallel>], iteration_bounds = array<i64: 2, 4>, scalar_prefetch = 0 : i64, scratch_operands = 0 : i64, tpu.core_type = #tpu.core_type<tc>, window_params = [{transform_indices = @transform_0, window_bounds = array<i64: 1, 16, 8>}, {transform_indices = @transform_1, window_bounds = array<i64: 1, 1, 2, 8>}, {pipeline_mode = #tpu.pipeline_mode<synchronous>, transform_indices = @transform_2, window_bounds = array<i64: 24, 128>}, {transform_indices = @transform_3, window_bounds = array<i64: 1, 16, 128>}]} {
    %c0 = arith.constant 0 : index
    %c0_0 = arith.constant 0 : index
    %c0_1 = arith.constant 0 : index
    %0 = vector.load %arg2[%c0, %c0_0, %c0_1] : memref<1x16x8xbf16, #tpu.memory_space<vmem>>, vector<1x16x8xbf16>
    %1 = vector.shape_cast %0 : vector<1x16x8xbf16> to vector<16x8xbf16>
    %2 = arith.extf %1 : vector<16x8xbf16> to vector<16x8xf32>
    %c0_2 = arith.constant 0 : index
    %c0_3 = arith.constant 0 : index
    %c0_4 = arith.constant 0 : index
    %c0_5 = arith.constant 0 : index
    %3 = vector.load %arg3[%c0_2, %c0_3, %c0_4, %c0_5] : memref<1x1x2x8xbf16, #tpu.memory_space<vmem>>, vector<1x1x2x8xbf16>
    %4 = vector.shape_cast %3 : vector<1x1x2x8xbf16> to vector<2x8xbf16>
    %5 = arith.extf %4 : vector<2x8xbf16> to vector<2x8xf32>
    %6 = tpu.iota {dimensions = array<i32: 0>} : vector<16x8xi32>
    %c1_i32 = arith.constant 1 : i32
    %7 = tpu.dynamic_rotate %2 by %c1_i32 dim 0 : vector<16x8xf32>, i32 -> vector<16x8xf32>
    %c0_i32 = arith.constant 0 : i32
    %8 = vector.broadcast %c0_i32 : i32 to vector<16x8xi32>
    %9 = arith.cmpi eq, %6, %8 : vector<16x8xi32>
    %10 = vector.extract_strided_slice %5 {offsets = [0, 0], sizes = [1, 8], strides = [1, 1]} : vector<2x8xf32> to vector<1x8xf32>
    %11 = vector.shape_cast %10 : vector<1x8xf32> to vector<1x8xf32>
    %12 = vector.broadcast %11 : vector<1x8xf32> to vector<16x8xf32>
    %13 = arith.select %9, %12, %7 : vector<16x8xi1>, vector<16x8xf32>
    %c15_i32 = arith.constant 15 : i32
    %14 = tpu.dynamic_rotate %2 by %c15_i32 dim 0 : vector<16x8xf32>, i32 -> vector<16x8xf32>
    %c15_i32_6 = arith.constant 15 : i32
    %15 = vector.broadcast %c15_i32_6 : i32 to vector<16x8xi32>
    %16 = arith.cmpi eq, %6, %15 : vector<16x8xi32>
    %17 = vector.extract_strided_slice %5 {offsets = [1, 0], sizes = [1, 8], strides = [1, 1]} : vector<2x8xf32> to vector<1x8xf32>
    %18 = vector.shape_cast %17 : vector<1x8xf32> to vector<1x8xf32>
    %19 = vector.broadcast %18 : vector<1x8xf32> to vector<16x8xf32>
    %20 = arith.select %16, %19, %14 : vector<16x8xi1>, vector<16x8xf32>
    %21 = tpu.concatenate %2, %13, %20 in 1 : vector<16x8xf32>, vector<16x8xf32>, vector<16x8xf32> -> vector<16x24xf32>
    %22 = arith.truncf %21 : vector<16x24xf32> to vector<16x24xbf16>
    %c0_7 = arith.constant 0 : index
    %c0_8 = arith.constant 0 : index
    %23 = vector.load %arg4[%c0_7, %c0_8] : memref<24x128xbf16, #tpu.memory_space<vmem>>, vector<24x128xbf16>
    %cst = arith.constant dense<0.000000e+00> : vector<16x128xf32>
    %24 = tpu.matmul %22, %23, %cst {dimension_numbers = #tpu.dot_dimension_numbers<[1], [0], [0], [1], [0, 0, 1, 1], [], []>} : vector<16x24xbf16>, vector<24x128xbf16>, vector<16x128xf32> -> vector<16x128xf32>
    %25 = vector.shape_cast %24 : vector<16x128xf32> to vector<1x16x128xf32>
    %c0_9 = arith.constant 0 : index
    %c0_10 = arith.constant 0 : index
    %c0_11 = arith.constant 0 : index
    %26 = vector.load %arg5[%c0_9, %c0_10, %c0_11] : memref<1x16x128xf32, #tpu.memory_space<vmem>>, vector<1x16x128xf32>
    tpu.vector_store %arg5[%c0_9, %c0_10, %c0_11], %25 {strides = array<i32>} : memref<1x16x128xf32, #tpu.memory_space<vmem>>, vector<1x16x128xf32>,
    return
  }
  func.func @transform_0(%arg0: i32, %arg1: i32) -> (i32, i32, i32) {
    %c0_i32 = arith.constant 0 : i32
    %c0_i32_0 = arith.constant 0 : i32
    return %arg0, %arg1, %c0_i32 : i32, i32, i32
  }
  func.func @transform_1(%arg0: i32, %arg1: i32) -> (i32, i32, i32, i32) {
    %c0_i32 = arith.constant 0 : i32
    %c0_i32_0 = arith.constant 0 : i32
    %c0_i32_1 = arith.constant 0 : i32
    return %arg0, %arg1, %c0_i32, %c0_i32_0 : i32, i32, i32, i32
  }
  func.func @transform_2(%arg0: i32, %arg1: i32) -> (i32, i32) {
    %c0_i32 = arith.constant 0 : i32
    %c0_i32_0 = arith.constant 0 : i32
    %c0_i32_1 = arith.constant 0 : i32
    return %c0_i32, %c0_i32_0 : i32, i32
  }
  func.func @transform_3(%arg0: i32, %arg1: i32) -> (i32, i32, i32) {
    %c0_i32 = arith.constant 0 : i32
    %c0_i32_0 = arith.constant 0 : i32
    return %arg0, %arg1, %c0_i32 : i32, i32, i32
  }
}

</mosaic_0001>

<bundles_post_ra>
// kernel: tpu_custom_call.1
= control target key start
LH: loop header
LB: loop body
LE: loop exit
PB: predicated region body
PF: predicated region fallthrough
CT: control target
= control target key end

     0   :  { %8 = vsyncpa [#allocation3], 0  ;;  %s864_s0 = inlined_call_operand.vmem [shape: bf16[2,64,8], index: 0, kind: input, shape index: {}]   ;;  %s865_s1 = inlined_call_operand.vmem [shape: bf16[2,4,2,8], index: 1, kind: input, shape index: {}]   ;;  %s866_s2 = inlined_call_operand.vmem [shape: bf16[24,128], index: 2, kind: input, shape index: {}]   ;;  %s867_s3 = inlined_call_operand.hbm [shape: f32[2,64,128], index: 3, kind: output, shape index: {}]  }
   0x1   :  { %10 = vsyncpa [#allocation3 + $0x1], 0  ;;  %s705_s12 = smov 0   ;;  %s707_s13 = smov 0  }
   0x2   :  { %s709_s14 = smov 0   ;;  %s711_s15 = smov 0  }
   0x3   :  { %s713_s16 = smov 0   ;;  %s715_s17 = smov 0  }
   0x4   :  { %s717_s18 = smov 0   ;;  %s719_s19 = smov 0  }
   0x5 LB: > { %s463_s20 = sadd.s32 4294967295, %s677_s19   ;;  %s464_s21 = sadd.s32 4294967294, %s677_s19   ;;  %s677_s19 = sphi %s719_s19, %s16_s19   ;;  %s673_s18 = sphi %s717_s18, %s876_s18   ;;  %s669_s17 = sphi %s715_s17, %s875_s17   ;;  %s665_s16 = sphi %s713_s16, %s874_s16   ;;  %s661_s15 = sphi %s711_s15, %s873_s15   ;;  %s657_s14 = sphi %s709_s14, %s872_s14   ;;  %s653_s13 = sphi %s707_s13, %s871_s13   ;;  %s649_s12 = sphi %s705_s12, %s870_s12  }
   0x6   : > { %s25_s22 = sadd.s32 1, %s669_s17  ;;  %s28_s23 = sadd.s32 1, %s673_s18 }
   0x7   : > { %p26_p0 = scmp.ge.s32.totalorder %s25_s22, 4  ;;  %p124_p1 = scmp.ne.s32.totalorder %s657_s14, %s653_s13 }
   0x8   : > { %p125_p2 = scmp.eq.s32.totalorder %s463_s20, 7  ;;  %p130_p5 = scmp.ne.s32.totalorder %s653_s13, %s649_s12 }
   0x9   : > { %s878_s22 = smov (%p26_p0, %s25_s22), 0  ;;  %s880_s23 = smov (!%p26_p0, %s28_s23), %s673_s18 }
   0xa   : > { %s110_s24 = ssub.s32 %s669_s17, %s878_s22  ;;  %p756_p3 = por %p125_p2, %p124_p1 }
   0xb   : > { %p30_p4 = scmp.ge.s32.totalorder %s880_s23, 2  ;;  %p131_p6 = scmp.eq.s32.totalorder %s464_s21, 7 }
   0xc   : > { %p467_p7 = scmp.ge.s32.totalorder %s677_s19, 1  ;;  %p175_p9 = scmp.lt.s32.totalorder %s677_s19, 9 }
   0xd   : > { %s882_s23 = smov (%p30_p4, %s880_s23), 0  ;;  %p765_p8 = por %p131_p6, %p130_p5 }
   0xe   : > { %s109_s27 = ssub.s32 %s673_s18, %s882_s23  ;;  %s114_s28 = sadd.s32 1, %s657_s14 }
   0xf   : > { %s111_s29 = sor.u32 %s110_s24, %s109_s27  ;;  %p176_p10 = pnand %p467_p7, %p175_p9 }
  0x10   : > { %p112_p11 = scmp.eq.s32.totalorder %s111_s29, 0  ;;  %s777_s4 = sshll.u32 (!%p176_p10), %s661_s15, 1 }
  0x11   : > { %179 = sbr.rel (%p176_p10) target bundleno = 373 (0x175), region = 32  ;;  %p211_p12 = scmp.lt.s32.totalorder (!%p176_p10), %s665_s16, 1 }
  0x12   : > { %s774_s30 = scalar_select %p112_p11, %s657_s14, %s114_s28  }
  0x13   : > { %p213_p13 = scmp.lt.s32.totalorder (!%p176_p10), %s777_s4, 7  ;;  %p222_p0 = scmp.lt.s32.totalorder (!%p176_p10), %s661_s15, 3 }
  0x14   : > { %s207_s10 = sand.u32 (!%p176_p10), 1, %s653_s13   ;;  %s478_s11 = sshll.u32 (!%p176_p10), %s665_s16, 3 }
  0x15   : > { %s468_s20 = sshll.u32 (!%p176_p10), %s207_s10, 4  ;;  %s363_s21 = sadd.s32 (!%p176_p10), %s478_s11, %s777_s4 }
  0x16   : > { %s212_s5 = scalar_select %p211_p12, %s665_s16, 1  ;;  %v235_v0 = vlaneseq  ;;  %v583_v2 = vld [vmem:[%s866_s2 + $0x8] ss:$0 sps:$4 sm:$0xff]   ;;  %vm303_vm0 = vcmask 1043456   ;;  %v679_v4 = vmov 0.0   ;;  %v584_v15 = vld [vmem:[%s866_s2] sm:$0xff]  }
  0x17   : > { %s214_s6 = scalar_select %p213_p13, %s777_s4, 7  ;;  %489 = vmatprep.subr.bf16.mxu0 %v679_v4  ;;  %v305_v5 = vsel %vm303_vm0, %v583_v2, 0  ;;  %vm680_vm5 = vmmov 0   ;;  %vm280_vm6 = vcmask 64512   ;;  %vm283_vm7 = vcmask 130048  }
  0x18   : > { %s470_s7 = sshll.u32 %s212_s5, 3  ;;  %v236_v1 = vshrl.u32 %v235_v0, 7  ;;  %s472_s27 = sshll.u32 %s212_s5, 2  ;;  %490 = vmatpush3.bf16.msra.mxu0 %v305_v5  ;;  %493 = vmatprep.mubr.msk.bf16.mxu0 %vm680_vm5, %v679_v4  ;;  %vm299_vm8 = vcmask 195584  }
  0x19   : > { %s216_s8 = sadd.s32 %s470_s7, %s214_s6  ;;  %s884_s15 = smov (!%p222_p0, %s661_s15), 3  ;;  %491 = vmatprep.subr.bf16.mxu0 %v679_v4 }
  0x1a   : > { %s471_s9 = sshll.u32 %s216_s8, 2  ;;  %vm240_vm1 = vcmp.lt.s32.totalorder %v236_v1, 1  ;;  %s225_s28 = sadd.s32 %s472_s27, %s884_s15  ;;  %v247_v8 = vsub.s32 0, %v236_v1  ;;  %v237_v9 = vadd.s32 8, %v236_v1  ;;  %vm253_vm2 = vcmp.lt.s32.totalorder %v236_v1, 7 }
  0x1b   : > { %s218_s24 = scalar_lea.vmem %s864_s0, %s471_s9  ;;  %v260_v10 = vsub.s32 1, %v236_v1  ;;  %s226_s5 = scalar_lea.vmem %s865_s1, %s225_s28  ;;  %vm243_vm3 = vcmp.eq.s32.totalorder %v236_v1, 0 }
  0x1c   : > { %v483_v3 = vld [vmem:[%s218_s24] sm:$0xff]   ;;  %492 = vmatpush3.bf16.msra.mxu0 %v584_v15  ;;  %vm257_vm4 = vcmp.eq.s32.totalorder %v237_v9, 15  ;;  %s681_s15 = smov 8   ;;  %s682_s9 = smov 16  }
  0x1d   : > { %v484_v6 = vunpack.c.l.bf16 %v483_v3  ;;  %v485_v7 = vunpack.c.h.bf16 %v483_v3  ;;  %v233_v16 = vld [vmem:[%s226_s5] sm:$0x1]  ;;  %s209_s24 = scalar_lea.vmem [#allocation2], %s468_s20  ;;  %s479_s28 = sshll.u32 %s363_s21, 7 }
  0x1e   : > { %v234_v17 = vunpack.c.l.bf16 %v233_v16  ;;  %s366_s27 = sshll.u32 %s209_s24, 4  ;;  %s810_s5 = scalar_lea.hbm %s867_s3, %s479_s28  ;;  %s805_s27 = int_to_ptr.vmem [resolvable:$true] %s366_s27 }
  0x1f   : > { %v238_v11 = vrot.slane %v484_v6, 7  ;;  %v239_v12 = vrot.slane %v485_v7, 7  ;;  %v251_v13 = vrot.slane %v484_v6, 1  ;;  %v252_v14 = vrot.slane %v485_v7, 1  ;;  %s812_s16 = scalar_lea.sflag [#allocation3], %s207_s10  ;;  %s585_s4 = scalar_lea.vmem %s805_s27, 256 }
  0x20   : > { %v248_v21 = vrot.slane %v234_v17, %v247_v8  ;;  %v261_v22 = vrot.slane %v234_v17, %v260_v10  ;;  %p586_p1 = scmp.ne.s32.totalorder %s805_s27, %s585_s4  ;;  %s683_s7 = smov [#allocation2]  }
  0x21   : > { %v242_v18 = vsel %vm240_vm1, %v239_v12, %v238_v11  ;;  %v255_v19 = vsel %vm253_vm2, %v252_v14, %v251_v13  ;;  %v241_v20 = vsel %vm240_vm1, %v238_v11, %v239_v12  ;;  %v254_v24 = vsel %vm253_vm2, %v251_v13, %v252_v14  ;;  %s589_s8 = sshll.u32 %s683_s7, 4  ;;  %s590_s8 = int_to_ptr.vmem [resolvable:$false] %s589_s8 }
  0x22   : > { %v249_v23 = vsel %vm243_vm3, %v248_v21, %v242_v18  ;;  %v263_v25 = vsel %vm257_vm4, %v261_v22, %v255_v19  ;;  %p587_p2 = pnand %p586_p1, %p756_p3  ;;  %p592_p5 = scmp.lt.s32.totalorder %s805_s27, %s590_s8 }
  0x23   : > { %v573_v26 = vpack.i.bf16 %v241_v20, %v249_v23  ;;  %v578_v27 = vpack.i.bf16 %v263_v25, %v254_v24 }
  0x24   : > { %p588_p4 = pneg %p587_p2 }
  0x25   : > { %574 = vrot.lane.b32.xlu0 %v573_v26, %s681_s15 }
  0x29   : > { %579 = vrot.lane.b32.xlu0 %v578_v27, %s682_s9  ;;  %s591_s9 = scalar_lea.vmem %s590_s8, 512 }
  0x2a   : > { %p593_p6 = scmp.lt.s32.totalorder %s591_s9, %s585_s4 }
  0x2c   : > { %p594_p7 = por %p593_p6, %p592_p5 }
  0x2e   : > { %p595_p9 = pnand %p594_p7, %p588_p4 }
  0x97   : > { %v575_v28 = vpop.permute.xlu0 %574 }
  0x98   : > { %v577_v29 = vunpack.i.h.bf16 %v575_v28  ;;  %v576_v30 = vunpack.i.l.bf16 %v575_v28 }
  0x9a   : > { %v282_v34 = vsel %vm280_vm6, %v485_v7, %v577_v29  ;;  %v281_v35 = vsel %vm280_vm6, %v484_v6, %v576_v30 }
  0x9b   : > { %v580_v31 = vpop.permute.xlu0 %579 }
  0x9c   : > { %v582_v32 = vunpack.i.h.bf16 %v580_v31  ;;  %v581_v33 = vunpack.i.l.bf16 %v580_v31 }
  0x9e   : > { %v284_v36 = vsel %vm283_vm7, %v281_v35, %v581_v33  ;;  %v285_v37 = vsel %vm283_vm7, %v282_v34, %v582_v32 }
  0x9f   : > { %v286_v38 = vpack.c.bf16 %v285_v37, %v284_v36 }
  0xa1   : > { %494 = vmatmul.mubr.msk.bf16.vlgmr.msra.gmra.mxu0 %vm299_vm8, %v286_v38 }
 0x161   : > { %v341_v39 = vpop.f32.mrf.mxu0 }
 0x162   : > { %348 = vst [vmem:[%s209_s24] sm:$0xff] %v341_v39 }
 0x163   : > { %v495_v40 = vpop.f32.mrf.mxu0 }
 0x165   : > { %v344_v41 = vpop.f32.mrf.mxu0 }
 0x166   : > { %349 = vst [vmem:[%s209_s24 + $0x8] sm:$0xff] %v344_v41 }
 0x167   : > { %v496_v42 = vpop.f32.mrf.mxu0 }
 0x168   : > { %598 = shalt.err (!%p595_p9)
}
 0x169   : > { %s599_s10 = scalar_lea.hbm %s810_s5, 256  ;;  %s603_s21 = scalar_lea.hbm %s867_s3, 2048 }
 0x16a   : > { %p600_p10 = scmp.ne.s32.totalorder %s810_s5, %s599_s10  ;;  %p604_p13 = scmp.lt.s32.totalorder %s810_s5, %s867_s3 }
 0x16b   : > { %p605_p0 = scmp.lt.s32.totalorder %s603_s21, %s599_s10 }
 0x16c   : > { %p601_p11 = pnand %p600_p10, %p756_p3 }
 0x16d   : > { %p606_p1 = por %p605_p0, %p604_p13 }
 0x16e   : > { %p602_p12 = pneg %p601_p11 }
 0x170   : > { %p607_p2 = pnand %p606_p1, %p602_p12 }
 0x172   : > { %610 = shalt.err (!%p607_p2)
}
 0x173   : > { %s684_s29 = smov 128  }
 0x174   : > { %497 = dma.vmem_to_hbm [thread:$0]  (%p756_p3), %s805_s27, 256, %s810_s5, %s812_s16, %s684_s29, %s684_s29, %s681_s15  }
 0x175 PF: > { %p503_p4 = scmp.ge.s32.totalorder %s677_s19, 2  ;;  %s381_s6 = sand.u32 1, %s649_s12  }
 0x176   : > { %s382_s4 = scalar_lea.sflag [#allocation3], %s381_s6 }
 0x177   : > { %p500_p5 = pnand %p503_p4, %p765_p8 }
 0x179   : > { %p501_p6 = pneg %p500_p5 }
 0x17b   : > { %644 = dma.done.wait (%p501_p6), %s382_s4, 256  }
 0x17c   : > { %646 = vsyncadd (%p501_p6), %s382_s4, 4294967040  ;;  %s16_s19 = sadd.s32 1, %s677_s19   ;;  %s870_s12 = smov %s653_s13 }
 0x17d   : > { %p13_p7 = scmp.ge.s32.totalorder %s16_s19, 10   ;;  %s871_s13 = smov %s657_s14 }
 0x17e   : > { %s872_s14 = smov %s774_s30  ;;  %s873_s15 = smov %s669_s17 }
 0x17f   : > { %s874_s16 = smov %s673_s18  ;;  %s875_s17 = smov %s878_s22 }
 0x180   : > { %s876_s18 = smov %s882_s23  ;;  %15 = sbr.rel (!%p13_p7) target bundleno = 5 (0x5), region = 70 }
 0x185   :  { %387 = vsyncpa [#allocation3], 1 }
 0x186   :  { %389 = vsyncpa [#allocation3 + $0x1], 1 }

</bundles_post_ra>
